<compile_context>
chip_gen: v6e
topology: v6e:2x2x1
jax: 0.10.0
libtpu: 0.0.40
codegen_flags: <defaults>
</compile_context>

<pallas_src>
import functools
import math

import jax
import jax.numpy as jnp
from jax.experimental import pallas as pl
from jax.experimental.pallas import tpu as pltpu


def _round_up(x, m):
    return ((x + m - 1) // m) * m


def _drop_path_kernel(x_ref, s_ref, o_ref):
    # (tile_b, tile_f) * (tile_b, 1) broadcast multiply in the native dtype.
    o_ref[...] = x_ref[...] * s_ref[...]


def drop_path(x, key, *, drop_prob, training=True):
    """DropPath / stochastic depth, matching the PyTorch module's forward."""
    if drop_prob == 0.0 or not training:
        return x  # identity fast path, exactly like the PyTorch module

    orig_shape = x.shape
    B = orig_shape[0]
    F = int(math.prod(orig_shape[1:])) if len(orig_shape) > 1 else 1
    x2 = x.reshape(B, F)

    keep_prob = 1.0 - float(drop_prob)
    # Per-sample 0/1 mask, computed once (floor(keep_prob + U) == 1 with
    # probability keep_prob), folded with the 1/keep_prob rescale and cast to
    # the tensor dtype so the kernel multiplies in the native dtype.
    u = jax.random.uniform(key, (B, 1), dtype=jnp.float32)
    scale = (jnp.floor(keep_prob + u) * (1.0 / keep_prob)).astype(x.dtype)

    itemsize = jnp.dtype(x.dtype).itemsize
    # Batch tile: == B for small batches, otherwise a multiple of 8 capped at
    # 64 so VMEM per block is bounded independently of B.
    tile_b = B if B <= 8 else min(64, _round_up(B, 8))
    # Feature tile: lane-dense multiple of 128, ~4 MiB per block.
    target_block_bytes = 4 * 1024 * 1024
    cap_f = max(128, (target_block_bytes // (tile_b * itemsize)) // 128 * 128)
    tile_f = min(_round_up(F, 128), cap_f)

    grid = (pl.cdiv(B, tile_b), pl.cdiv(F, tile_f))

    out = pl.pallas_call(
        _drop_path_kernel,
        out_shape=jax.ShapeDtypeStruct((B, F), x.dtype),
        grid=grid,
        in_specs=[
            pl.BlockSpec((tile_b, tile_f), lambda i, j: (i, j)),
            pl.BlockSpec((tile_b, 1), lambda i, j: (i, 0)),
        ],
        out_specs=pl.BlockSpec((tile_b, tile_f), lambda i, j: (i, j)),
        compiler_params=pltpu.CompilerParams(
            dimension_semantics=("parallel", "parallel"),
            vmem_limit_bytes=48 * 1024 * 1024,
        ),
    )(x2, scale)

    return out.reshape(orig_shape)


# ---------------------------------------------------------------------------
if __name__ == "__main__":
    root = jax.random.PRNGKey(0)
    data_key, mask_key = jax.random.split(root)

    B, C, H, W = 2, 4, 16, 16
    x = jax.random.normal(data_key, (B, C, H, W), jnp.float32)
    drop_prob = 0.25
    keep_prob = 1.0 - drop_prob

    fwd = jax.jit(functools.partial(drop_path, drop_prob=drop_prob, training=True))
    y = jax.block_until_ready(fwd(x, mask_key))

    assert y.shape == x.shape and y.dtype == x.dtype, (y.shape, y.dtype)
    assert bool(jnp.all(jnp.isfinite(y)))

    # Bit-level reference: same key -> same per-sample mask.
    u_ref = jax.random.uniform(mask_key, (B, 1), dtype=jnp.float32)
    mask_ref = jnp.floor(keep_prob + u_ref)
    ref = (x.reshape(B, -1) * (mask_ref / keep_prob).astype(x.dtype)).reshape(x.shape)
    assert bool(jnp.allclose(y, ref, atol=1e-6, rtol=1e-6)), "mismatch vs reference"

    # Per-sample semantics: each sample is either dropped (all zeros) or kept
    # and rescaled by 1/keep_prob.
    x_scaled = x / keep_prob
    for b in range(B):
        zero_row = bool(jnp.max(jnp.abs(y[b])) == 0.0)
        scaled_row = bool(jnp.max(jnp.abs(y[b] - x_scaled[b])) < 1e-5)
        assert zero_row or scaled_row, f"sample {b}: neither dropped nor kept+scaled"

    # Identity fast paths (no kernel launched), matching PyTorch semantics.
    y_eval = drop_path(x, mask_key, drop_prob=drop_prob, training=False)
    assert bool(jnp.all(y_eval == x))
    y_p0 = drop_path(x, mask_key, drop_prob=0.0, training=True)
    assert bool(jnp.all(y_p0 == x))

    # bf16 data path: tensor dtype preserved end-to-end, multiply in bf16.
    y_bf16 = jax.block_until_ready(
        drop_path(x.astype(jnp.bfloat16), mask_key, drop_prob=drop_prob, training=True))
    assert y_bf16.dtype == jnp.bfloat16 and y_bf16.shape == x.shape
    assert bool(jnp.all(jnp.isfinite(y_bf16.astype(jnp.float32))))

    print("KERNEL_OK")
</pallas_src>

<mosaic_0001>
module attributes {stable_mosaic.version = 11 : i64} {
  func.func @_drop_path_kernel(%arg0: i32, %arg1: i32, %arg2: memref<2x1024xf32, #tpu.memory_space<vmem>>, %arg3: memref<2x1xf32, #tpu.memory_space<vmem>>, %arg4: memref<2x1024xf32, #tpu.memory_space<vmem>>) attributes {dimension_semantics = [#tpu.dimension_semantics<parallel>, #tpu.dimension_semantics<parallel>], iteration_bounds = array<i64: 1, 1>, scalar_prefetch = 0 : i64, scratch_operands = 0 : i64, tpu.core_type = #tpu.core_type<tc>, window_params = [{transform_indices = @transform_0, window_bounds = array<i64: 2, 1024>}, {transform_indices = @transform_1, window_bounds = array<i64: 2, 1>}, {transform_indices = @transform_2, window_bounds = array<i64: 2, 1024>}]} {
    %c0 = arith.constant 0 : index
    %c0_0 = arith.constant 0 : index
    %0 = vector.load %arg2[%c0, %c0_0] : memref<2x1024xf32, #tpu.memory_space<vmem>>, vector<2x1024xf32>
    %c0_1 = arith.constant 0 : index
    %c0_2 = arith.constant 0 : index
    %1 = vector.load %arg3[%c0_1, %c0_2] : memref<2x1xf32, #tpu.memory_space<vmem>>, vector<2x1xf32>
    %2 = vector.broadcast %1 : vector<2x1xf32> to vector<2x1024xf32>
    %3 = arith.mulf %0, %2 : vector<2x1024xf32>
    %c0_3 = arith.constant 0 : index
    %c0_4 = arith.constant 0 : index
    %4 = vector.load %arg4[%c0_3, %c0_4] : memref<2x1024xf32, #tpu.memory_space<vmem>>, vector<2x1024xf32>
    tpu.vector_store %arg4[%c0_3, %c0_4], %3 {strides = array<i32>} : memref<2x1024xf32, #tpu.memory_space<vmem>>, vector<2x1024xf32>,
    return
  }
  func.func @transform_0(%arg0: i32, %arg1: i32) -> (i32, i32) {
    %c0_i32 = arith.constant 0 : i32
    return %arg0, %arg1 : i32, i32
  }
  func.func @transform_1(%arg0: i32, %arg1: i32) -> (i32, i32) {
    %c0_i32 = arith.constant 0 : i32
    %c0_i32_0 = arith.constant 0 : i32
    return %arg0, %c0_i32 : i32, i32
  }
  func.func @transform_2(%arg0: i32, %arg1: i32) -> (i32, i32) {
    %c0_i32 = arith.constant 0 : i32
    return %arg0, %arg1 : i32, i32
  }
}

</mosaic_0001>

<bundles_post_ra>
// kernel: drop_path.1
= control target key start
LH: loop header
LB: loop body
LE: loop exit
PB: predicated region body
PF: predicated region fallthrough
CT: control target
= control target key end

     0   :  { %v37_v0 = vmov 0   ;;  %v38_v2 = vmov 269488144   ;;  %v21_v4 = vlaneseq  ;;  %s69_s1 = inlined_call_operand.vmem [shape: f32[2,1], index: 1, kind: input, shape index: {}]   ;;  %s70_s0 = inlined_call_operand.vmem [shape: f32[2,1024], index: 0, kind: input, shape index: {}]   ;;  %s71_s2 = inlined_call_operand.vmem [shape: f32[2,1024], index: 2, kind: output, shape index: {}]  }
   0x1   :  { %36 = vset.pattern.permute.xlu0 %v37_v0  ;;  %v13_v1 = vld [vmem:[%s69_s1] sm:$0x3]  ;;  %v19_v3 = vunpack.c.l.s4 %v38_v2  ;;  %v12_v10 = vld [vmem:[%s70_s0 + $0x8] sm:$0xff] }
   0x2   :  { %16 = vperm.xlu0 %36, %v13_v1   ;;  %v22_v6 = vshrl.u32 %v21_v4, 7  ;;  %v11_v9 = vld [vmem:[%s70_s0] sm:$0xff] }
   0x3   :  { %v20_v5 = vunpack.c.0.s8 %v19_v3 }
   0x5   :  { %v23_v7 = vsub.s32 %v20_v5, %v22_v6 }
  0x7d   :  { %v17_v8 = vpop.permute.xlu0 %16 }
  0x7e   :  { %v24_v11 = vrot.slane %v17_v8, %v23_v7 }
  0x80   :  { %v26_v12 = vmul.f32 %v24_v11, %v11_v9  ;;  %v27_v13 = vmul.f32 %v24_v11, %v12_v10 }
  0x82   :  { %28 = vst [vmem:[%s71_s2] sm:$0xff] %v26_v12  ;;  %29 = vst [vmem:[%s71_s2 + $0x8] sm:$0xff] %v27_v13 }

</bundles_post_ra>
